<compile_context>
chip_gen: v7x
topology: tpu7x:2x2x1
jax: 0.10.0
libtpu: 0.0.40
codegen_flags: <defaults>
</compile_context>

<pallas_src>
import functools

import jax
import jax.numpy as jnp
from jax.experimental import pallas as pl
from jax.experimental.pallas import tpu as pltpu


def _round_up(x, m):
    return ((x + m - 1) // m) * m


def _rbrsint2_kernel(gu_ref, gi_ref, gr_ref, out_ref, *, n_rules, nint):
    """Computes xui for one batch tile.

    gu_ref:  (bm, K)            user embeddings for this tile
    gi_ref:  (bm, K)            item embeddings for this tile
    gr_ref:  (K, n_rules*nint)  rule matrix (whole thing, resident every step)
    out_ref: (1, bm)            disjunction score xui (lane-dense row)
    """
    gu = gu_ref[...]
    gi = gi_ref[...]
    gr = gr_ref[...]
    bm = gu.shape[0]

    # Two MXU pushes per tile (instead of 2*n_rules tiny, heavily-padded ones).
    logits_all = jnp.dot(gu, gr, preferred_element_type=jnp.float32)  # (bm, R*nint)
    gi_proj = jnp.dot(gi, gr, preferred_element_type=jnp.float32)     # (bm, R*nint)
    base = jnp.sum(gu * gi, axis=-1, keepdims=True)                   # (bm, 1)

    log_sum = jnp.zeros((bm, 1), jnp.float32)

    # n_rules is a small compile-time constant -> static Python loop with
    # static lane slices (no dynamic gather, no relayout).
    for r in range(n_rules):
        lo = r * nint
        logits = logits_all[:, lo:lo + nint]                          # (bm, nint)
        m = jnp.max(logits, axis=-1, keepdims=True)
        e = jnp.exp(logits - m)
        p = e / jnp.sum(e, axis=-1, keepdims=True)                    # softmax

        # score_and_r = sum((gu + p @ Gr_r^T) * gi)
        #             = base + sum_j p_j * (gi @ Gr_r)_j
        score = base + jnp.sum(p * gi_proj[:, lo:lo + nint],
                               axis=-1, keepdims=True)                # (bm, 1)

        # log(1 - sigmoid(x) + 1e-40): the eps is subnormal on TPU f32 (flushed
        # to 0), so use the exact identity log(1 - sigmoid(x)) = -softplus(x),
        # written with primitive-safe ops (max/abs/exp/log -> VPU + EUP).
        softplus = jnp.maximum(score, 0.0) + jnp.log(1.0 + jnp.exp(-jnp.abs(score)))
        log_sum = log_sum - softplus

    # disjunction_rule:  1 - (-1 / (-1 + log_sum))
    xui = 1.0 - (-1.0) / (-1.0 + log_sum)                             # (bm, 1)
    out_ref[...] = xui.reshape(1, bm)                                 # lane-dense store


def rbrsint2_forward(gu_table, gi_table, gr, users, items, *, n_rules, nint,
                     block_b=1024):
    """Pallas implementation of RBRSINT2Model.forward((users, items))."""
    B = users.shape[0]
    K = gu_table.shape[1]

    # Batch tile: as large as the (sublane-rounded) batch, capped at block_b.
    b_rounded = _round_up(B, 8)
    bm = min(block_b, b_rounded)
    if bm < b_rounded:
        # Multi-tile grid -> lane-dense output tiles need bm % 128 == 0.
        assert bm % 128 == 0, "block_b must be a multiple of 128 for multi-tile grids"
    B_pad = _round_up(B, bm)

    # Pad the *indices* (cheap) rather than the gathered (B, K) matrices, so the
    # embedding gather directly produces tile-aligned kernel inputs and we never
    # re-copy the dominant arrays through HBM.
    if B_pad != B:
        pad = B_pad - B
        users_p = jnp.pad(users, (0, pad))   # index 0 is always valid
        items_p = jnp.pad(items, (0, pad))
    else:
        users_p, items_p = users, items

    gu_full = gu_table[users_p].astype(jnp.float32)        # (B_pad, K) gather (glue)
    gi_full = gi_table[items_p].astype(jnp.float32)        # (B_pad, K)
    gr = gr.astype(jnp.float32)

    num_tiles = B_pad // bm
    kernel = functools.partial(_rbrsint2_kernel, n_rules=n_rules, nint=nint)

    out = pl.pallas_call(
        kernel,
        out_shape=jax.ShapeDtypeStruct((1, B_pad), jnp.float32),
        grid=(num_tiles,),
        in_specs=[
            pl.BlockSpec((bm, K), lambda i: (i, 0)),
            pl.BlockSpec((bm, K), lambda i: (i, 0)),
            pl.BlockSpec((K, n_rules * nint), lambda i: (0, 0)),
        ],
        out_specs=pl.BlockSpec((1, bm), lambda i: (0, i)),
        compiler_params=pltpu.CompilerParams(
            dimension_semantics=("parallel",)),
    )(gu_full, gi_full, gr)

    xui = out.reshape(-1)[:B]
    gu = gu_full[:B] if B_pad != B else gu_full
    gamma_i = gi_full[:B] if B_pad != B else gi_full
    return xui, gu, gamma_i


# ----------------------------------------------------------------------------
# Deterministic parameter init (xavier uniform, same shapes as the module).
# ----------------------------------------------------------------------------
def xavier_uniform(key, shape):
    fan_out, fan_in = shape
    bound = (6.0 / (fan_in + fan_out)) ** 0.5
    return jax.random.uniform(key, shape, jnp.float32, -bound, bound)


def reference_forward(gu_table, gi_table, gr, users, items, *, n_rules, nint):
    """Pure-JAX reference reproducing the PyTorch forward literally."""
    gu = gu_table[users]
    gamma_i = gi_table[items]
    and_scores = []
    for r in range(n_rules):
        gr_r = gr[:, r * nint:(r + 1) * nint]
        u_int_r = jax.nn.softmax(gu @ gr_r, axis=1) @ gr_r.T
        gamma_u_r = gu + u_int_r
        score_and = jnp.sum(gamma_u_r * gamma_i, -1)
        and_scores.append(score_and[:, None])
    and_scores_tensor = jax.nn.sigmoid(jnp.concatenate(and_scores, axis=1))
    expr = jnp.log(1.0 - and_scores_tensor + 1e-40)
    log_sum = jnp.sum(expr, axis=1)
    xui = 1.0 - (-1.0) / (-1.0 + log_sum)
    return xui, gu, gamma_i


if __name__ == "__main__":
    # Small, forward-consistent shapes.
    num_users, num_items = 50, 80
    embed_k = 32
    n_rules = 4
    nint = 8

    key = jax.random.PRNGKey(0)
    k_gu, k_gi, k_gr = jax.random.split(key, 3)

    Gu = xavier_uniform(k_gu, (num_users, embed_k))          # Embedding weight
    Gi = xavier_uniform(k_gi, (num_items, embed_k))          # Embedding weight
    Gr = xavier_uniform(k_gr, (embed_k, nint * n_rules))     # rule parameter

    # Exercise: single tile, ragged (index-padded) tail, and multi-tile grid.
    for batch, block_b in [(8, 1024), (13, 1024), (256, 128)]:
        ku, ki = jax.random.split(jax.random.fold_in(key, batch))
        users = jax.random.randint(ku, (batch,), 0, num_users)
        items = jax.random.randint(ki, (batch,), 0, num_items)

        xui, gu, gamma_i = rbrsint2_forward(
            Gu, Gi, Gr, users, items, n_rules=n_rules, nint=nint,
            block_b=block_b)
        jax.block_until_ready((xui, gu, gamma_i))

        xui_ref, gu_ref, gi_ref = reference_forward(
            Gu, Gi, Gr, users, items, n_rules=n_rules, nint=nint)

        assert xui.shape == (batch,)
        assert gu.shape == (batch, embed_k) and gamma_i.shape == (batch, embed_k)
        assert jnp.allclose(xui, xui_ref, rtol=1e-5, atol=1e-5), (
            batch, float(jnp.max(jnp.abs(xui - xui_ref))))
        assert jnp.allclose(gu, gu_ref) and jnp.allclose(gamma_i, gi_ref)

    print("KERNEL_OK")
</pallas_src>

<mosaic_0001>
module attributes {stable_mosaic.version = 11 : i64} {
  func.func @_rbrsint2_kernel(%arg0: i32, %arg1: memref<8x32xf32, #tpu.memory_space<vmem>>, %arg2: memref<8x32xf32, #tpu.memory_space<vmem>>, %arg3: memref<32x32xf32, #tpu.memory_space<vmem>>, %arg4: memref<1x8xf32, #tpu.memory_space<vmem>>) attributes {dimension_semantics = [#tpu.dimension_semantics<parallel>], iteration_bounds = array<i64: 1>, scalar_prefetch = 0 : i64, scratch_operands = 0 : i64, tpu.core_type = #tpu.core_type<tc>, window_params = [{transform_indices = @transform_0, window_bounds = array<i64: 8, 32>}, {transform_indices = @transform_1, window_bounds = array<i64: 8, 32>}, {pipeline_mode = #tpu.pipeline_mode<synchronous>, transform_indices = @transform_2, window_bounds = array<i64: 32, 32>}, {transform_indices = @transform_3, window_bounds = array<i64: 1, 8>}]} {
    %c0 = arith.constant 0 : index
    %c0_0 = arith.constant 0 : index
    %0 = vector.load %arg1[%c0, %c0_0] : memref<8x32xf32, #tpu.memory_space<vmem>>, vector<8x32xf32>
    %c0_1 = arith.constant 0 : index
    %c0_2 = arith.constant 0 : index
    %1 = vector.load %arg2[%c0_1, %c0_2] : memref<8x32xf32, #tpu.memory_space<vmem>>, vector<8x32xf32>
    %c0_3 = arith.constant 0 : index
    %c0_4 = arith.constant 0 : index
    %2 = vector.load %arg3[%c0_3, %c0_4] : memref<32x32xf32, #tpu.memory_space<vmem>>, vector<32x32xf32>
    %cst = arith.constant dense<0.000000e+00> : vector<8x32xf32>
    %3 = tpu.matmul %0, %2, %cst {dimension_numbers = #tpu.dot_dimension_numbers<[1], [0], [0], [1], [0, 0, 1, 1], [], []>} : vector<8x32xf32>, vector<32x32xf32>, vector<8x32xf32> -> vector<8x32xf32>
    %cst_5 = arith.constant dense<0.000000e+00> : vector<8x32xf32>
    %4 = tpu.matmul %1, %2, %cst_5 {dimension_numbers = #tpu.dot_dimension_numbers<[1], [0], [0], [1], [0, 0, 1, 1], [], []>} : vector<8x32xf32>, vector<32x32xf32>, vector<8x32xf32> -> vector<8x32xf32>
    %5 = arith.mulf %0, %1 : vector<8x32xf32>
    %cst_6 = arith.constant dense<0.000000e+00> : vector<8xf32>
    %6 = vector.multi_reduction <add>, %5, %cst_6 [1] : vector<8x32xf32> to vector<8xf32>
    %7 = vector.shape_cast %6 : vector<8xf32> to vector<8x1xf32>
    %cst_7 = arith.constant 0.000000e+00 : f32
    %8 = vector.broadcast %cst_7 : f32 to vector<8x1xf32>
    %9 = vector.extract_strided_slice %3 {offsets = [0, 0], sizes = [8, 8], strides = [1, 1]} : vector<8x32xf32> to vector<8x8xf32>
    %cst_8 = arith.constant dense<0xFF800000> : vector<8xf32>
    %10 = vector.multi_reduction <maximumf>, %9, %cst_8 [1] : vector<8x8xf32> to vector<8xf32>
    %11 = vector.shape_cast %10 : vector<8xf32> to vector<8x1xf32>
    %12 = vector.broadcast %11 : vector<8x1xf32> to vector<8x8xf32>
    %13 = arith.subf %9, %12 : vector<8x8xf32>
    %14 = math.exp %13 : vector<8x8xf32>
    %cst_9 = arith.constant dense<0.000000e+00> : vector<8xf32>
    %15 = vector.multi_reduction <add>, %14, %cst_9 [1] : vector<8x8xf32> to vector<8xf32>
    %16 = vector.shape_cast %15 : vector<8xf32> to vector<8x1xf32>
    %17 = vector.broadcast %16 : vector<8x1xf32> to vector<8x8xf32>
    %18 = arith.divf %14, %17 : vector<8x8xf32>
    %19 = vector.extract_strided_slice %4 {offsets = [0, 0], sizes = [8, 8], strides = [1, 1]} : vector<8x32xf32> to vector<8x8xf32>
    %20 = arith.mulf %18, %19 : vector<8x8xf32>
    %cst_10 = arith.constant dense<0.000000e+00> : vector<8xf32>
    %21 = vector.multi_reduction <add>, %20, %cst_10 [1] : vector<8x8xf32> to vector<8xf32>
    %22 = vector.shape_cast %21 : vector<8xf32> to vector<8x1xf32>
    %23 = arith.addf %7, %22 : vector<8x1xf32>
    %cst_11 = arith.constant 0.000000e+00 : f32
    %24 = vector.broadcast %cst_11 : f32 to vector<8x1xf32>
    %25 = arith.maximumf %23, %24 : vector<8x1xf32>
    %26 = math.absf %23 : vector<8x1xf32>
    %cst_12 = arith.constant 0.000000e+00 : f32
    %27 = vector.broadcast %cst_12 : f32 to vector<8x1xf32>
    %28 = arith.subf %27, %26 : vector<8x1xf32>
    %29 = math.exp %28 : vector<8x1xf32>
    %cst_13 = arith.constant 1.000000e+00 : f32
    %30 = vector.broadcast %cst_13 : f32 to vector<8x1xf32>
    %31 = arith.addf %30, %29 : vector<8x1xf32>
    %32 = math.log %31 : vector<8x1xf32>
    %33 = arith.addf %25, %32 : vector<8x1xf32>
    %34 = arith.subf %8, %33 : vector<8x1xf32>
    %35 = vector.extract_strided_slice %3 {offsets = [0, 8], sizes = [8, 8], strides = [1, 1]} : vector<8x32xf32> to vector<8x8xf32>
    %cst_14 = arith.constant dense<0xFF800000> : vector<8xf32>
    %36 = vector.multi_reduction <maximumf>, %35, %cst_14 [1] : vector<8x8xf32> to vector<8xf32>
    %37 = vector.shape_cast %36 : vector<8xf32> to vector<8x1xf32>
    %38 = vector.broadcast %37 : vector<8x1xf32> to vector<8x8xf32>
    %39 = arith.subf %35, %38 : vector<8x8xf32>
    %40 = math.exp %39 : vector<8x8xf32>
    %cst_15 = arith.constant dense<0.000000e+00> : vector<8xf32>
    %41 = vector.multi_reduction <add>, %40, %cst_15 [1] : vector<8x8xf32> to vector<8xf32>
    %42 = vector.shape_cast %41 : vector<8xf32> to vector<8x1xf32>
    %43 = vector.broadcast %42 : vector<8x1xf32> to vector<8x8xf32>
    %44 = arith.divf %40, %43 : vector<8x8xf32>
    %45 = vector.extract_strided_slice %4 {offsets = [0, 8], sizes = [8, 8], strides = [1, 1]} : vector<8x32xf32> to vector<8x8xf32>
    %46 = arith.mulf %44, %45 : vector<8x8xf32>
    %cst_16 = arith.constant dense<0.000000e+00> : vector<8xf32>
    %47 = vector.multi_reduction <add>, %46, %cst_16 [1] : vector<8x8xf32> to vector<8xf32>
    %48 = vector.shape_cast %47 : vector<8xf32> to vector<8x1xf32>
    %49 = arith.addf %7, %48 : vector<8x1xf32>
    %cst_17 = arith.constant 0.000000e+00 : f32
    %50 = vector.broadcast %cst_17 : f32 to vector<8x1xf32>
    %51 = arith.maximumf %49, %50 : vector<8x1xf32>
    %52 = math.absf %49 : vector<8x1xf32>
    %cst_18 = arith.constant 0.000000e+00 : f32
    %53 = vector.broadcast %cst_18 : f32 to vector<8x1xf32>
    %54 = arith.subf %53, %52 : vector<8x1xf32>
    %55 = math.exp %54 : vector<8x1xf32>
    %cst_19 = arith.constant 1.000000e+00 : f32
    %56 = vector.broadcast %cst_19 : f32 to vector<8x1xf32>
    %57 = arith.addf %56, %55 : vector<8x1xf32>
    %58 = math.log %57 : vector<8x1xf32>
    %59 = arith.addf %51, %58 : vector<8x1xf32>
    %60 = arith.subf %34, %59 : vector<8x1xf32>
    %61 = vector.extract_strided_slice %3 {offsets = [0, 16], sizes = [8, 8], strides = [1, 1]} : vector<8x32xf32> to vector<8x8xf32>
    %cst_20 = arith.constant dense<0xFF800000> : vector<8xf32>
    %62 = vector.multi_reduction <maximumf>, %61, %cst_20 [1] : vector<8x8xf32> to vector<8xf32>
    %63 = vector.shape_cast %62 : vector<8xf32> to vector<8x1xf32>
    %64 = vector.broadcast %63 : vector<8x1xf32> to vector<8x8xf32>
    %65 = arith.subf %61, %64 : vector<8x8xf32>
    %66 = math.exp %65 : vector<8x8xf32>
    %cst_21 = arith.constant dense<0.000000e+00> : vector<8xf32>
    %67 = vector.multi_reduction <add>, %66, %cst_21 [1] : vector<8x8xf32> to vector<8xf32>
    %68 = vector.shape_cast %67 : vector<8xf32> to vector<8x1xf32>
    %69 = vector.broadcast %68 : vector<8x1xf32> to vector<8x8xf32>
    %70 = arith.divf %66, %69 : vector<8x8xf32>
    %71 = vector.extract_strided_slice %4 {offsets = [0, 16], sizes = [8, 8], strides = [1, 1]} : vector<8x32xf32> to vector<8x8xf32>
    %72 = arith.mulf %70, %71 : vector<8x8xf32>
    %cst_22 = arith.constant dense<0.000000e+00> : vector<8xf32>
    %73 = vector.multi_reduction <add>, %72, %cst_22 [1] : vector<8x8xf32> to vector<8xf32>
    %74 = vector.shape_cast %73 : vector<8xf32> to vector<8x1xf32>
    %75 = arith.addf %7, %74 : vector<8x1xf32>
    %cst_23 = arith.constant 0.000000e+00 : f32
    %76 = vector.broadcast %cst_23 : f32 to vector<8x1xf32>
    %77 = arith.maximumf %75, %76 : vector<8x1xf32>
    %78 = math.absf %75 : vector<8x1xf32>
    %cst_24 = arith.constant 0.000000e+00 : f32
    %79 = vector.broadcast %cst_24 : f32 to vector<8x1xf32>
    %80 = arith.subf %79, %78 : vector<8x1xf32>
    %81 = math.exp %80 : vector<8x1xf32>
    %cst_25 = arith.constant 1.000000e+00 : f32
    %82 = vector.broadcast %cst_25 : f32 to vector<8x1xf32>
    %83 = arith.addf %82, %81 : vector<8x1xf32>
    %84 = math.log %83 : vector<8x1xf32>
    %85 = arith.addf %77, %84 : vector<8x1xf32>
    %86 = arith.subf %60, %85 : vector<8x1xf32>
    %87 = vector.extract_strided_slice %3 {offsets = [0, 24], sizes = [8, 8], strides = [1, 1]} : vector<8x32xf32> to vector<8x8xf32>
    %cst_26 = arith.constant dense<0xFF800000> : vector<8xf32>
    %88 = vector.multi_reduction <maximumf>, %87, %cst_26 [1] : vector<8x8xf32> to vector<8xf32>
    %89 = vector.shape_cast %88 : vector<8xf32> to vector<8x1xf32>
    %90 = vector.broadcast %89 : vector<8x1xf32> to vector<8x8xf32>
    %91 = arith.subf %87, %90 : vector<8x8xf32>
    %92 = math.exp %91 : vector<8x8xf32>
    %cst_27 = arith.constant dense<0.000000e+00> : vector<8xf32>
    %93 = vector.multi_reduction <add>, %92, %cst_27 [1] : vector<8x8xf32> to vector<8xf32>
    %94 = vector.shape_cast %93 : vector<8xf32> to vector<8x1xf32>
    %95 = vector.broadcast %94 : vector<8x1xf32> to vector<8x8xf32>
    %96 = arith.divf %92, %95 : vector<8x8xf32>
    %97 = vector.extract_strided_slice %4 {offsets = [0, 24], sizes = [8, 8], strides = [1, 1]} : vector<8x32xf32> to vector<8x8xf32>
    %98 = arith.mulf %96, %97 : vector<8x8xf32>
    %cst_28 = arith.constant dense<0.000000e+00> : vector<8xf32>
    %99 = vector.multi_reduction <add>, %98, %cst_28 [1] : vector<8x8xf32> to vector<8xf32>
    %100 = vector.shape_cast %99 : vector<8xf32> to vector<8x1xf32>
    %101 = arith.addf %7, %100 : vector<8x1xf32>
    %cst_29 = arith.constant 0.000000e+00 : f32
    %102 = vector.broadcast %cst_29 : f32 to vector<8x1xf32>
    %103 = arith.maximumf %101, %102 : vector<8x1xf32>
    %104 = math.absf %101 : vector<8x1xf32>
    %cst_30 = arith.constant 0.000000e+00 : f32
    %105 = vector.broadcast %cst_30 : f32 to vector<8x1xf32>
    %106 = arith.subf %105, %104 : vector<8x1xf32>
    %107 = math.exp %106 : vector<8x1xf32>
    %cst_31 = arith.constant 1.000000e+00 : f32
    %108 = vector.broadcast %cst_31 : f32 to vector<8x1xf32>
    %109 = arith.addf %108, %107 : vector<8x1xf32>
    %110 = math.log %109 : vector<8x1xf32>
    %111 = arith.addf %103, %110 : vector<8x1xf32>
    %112 = arith.subf %86, %111 : vector<8x1xf32>
    %cst_32 = arith.constant -1.000000e+00 : f32
    %113 = vector.broadcast %cst_32 : f32 to vector<8x1xf32>
    %114 = arith.addf %113, %112 : vector<8x1xf32>
    %cst_33 = arith.constant -1.000000e+00 : f32
    %115 = vector.broadcast %cst_33 : f32 to vector<8x1xf32>
    %116 = arith.divf %115, %114 : vector<8x1xf32>
    %cst_34 = arith.constant 1.000000e+00 : f32
    %117 = vector.broadcast %cst_34 : f32 to vector<8x1xf32>
    %118 = arith.subf %117, %116 : vector<8x1xf32>
    %119 = vector.shape_cast %118 : vector<8x1xf32> to vector<1x8xf32>
    %c0_35 = arith.constant 0 : index
    %c0_36 = arith.constant 0 : index
    %120 = vector.load %arg4[%c0_35, %c0_36] : memref<1x8xf32, #tpu.memory_space<vmem>>, vector<1x8xf32>
    tpu.vector_store %arg4[%c0_35, %c0_36], %119 {strides = array<i32>} : memref<1x8xf32, #tpu.memory_space<vmem>>, vector<1x8xf32>,
    return
  }
  func.func @transform_0(%arg0: i32) -> (i32, i32) {
    %c0_i32 = arith.constant 0 : i32
    %c0_i32_0 = arith.constant 0 : i32
    return %arg0, %c0_i32 : i32, i32
  }
  func.func @transform_1(%arg0: i32) -> (i32, i32) {
    %c0_i32 = arith.constant 0 : i32
    %c0_i32_0 = arith.constant 0 : i32
    return %arg0, %c0_i32 : i32, i32
  }
  func.func @transform_2(%arg0: i32) -> (i32, i32) {
    %c0_i32 = arith.constant 0 : i32
    %c0_i32_0 = arith.constant 0 : i32
    %c0_i32_1 = arith.constant 0 : i32
    return %c0_i32, %c0_i32_0 : i32, i32
  }
  func.func @transform_3(%arg0: i32) -> (i32, i32) {
    %c0_i32 = arith.constant 0 : i32
    %c0_i32_0 = arith.constant 0 : i32
    return %c0_i32, %arg0 : i32, i32
  }
}

</mosaic_0001>

<bundles_post_ra>
// kernel: tpu_custom_call.1
= control target key start
LH: loop header
LB: loop body
LE: loop exit
PB: predicated region body
PF: predicated region fallthrough
CT: control target
= control target key end

     0   :  { %8 = vsyncpa [#allocation3], 0  ;;  %s659_s0 = inlined_call_operand.hbm [shape: f32[8,32], index: 0, kind: input, shape index: {}]   ;;  %s660_s1 = inlined_call_operand.hbm [shape: f32[8,32], index: 1, kind: input, shape index: {}]   ;;  %s661_s2 = inlined_call_operand.hbm [shape: f32[32,32], index: 2, kind: input, shape index: {}]   ;;  %s662_s3 = inlined_call_operand.hbm [shape: f32[1,8], index: 3, kind: output, shape index: {}]  }
   0x1   :  { %9 = vsyncpa [#allocation6], 0 }
   0x2   :  { %10 = vsyncpa [#allocation4], 0  ;;  %s557_s12 = smov [#allocation5]   ;;  %s558_s14 = smov [#allocation2]  }
   0x3   :  { %s27_s13 = sshll.u32 %s557_s12, 4  ;;  %s17_s15 = sshll.u32 %s558_s14, 4  ;;  %s28_s13 = int_to_ptr.vmem [resolvable:$true] %s27_s13  ;;  %s18_s15 = int_to_ptr.vmem [resolvable:$true] %s17_s15 }
   0x4   :  { %s463_s18 = scalar_lea.hbm %s660_s1, 128 }
   0x5   :  { %p464_p0 = scmp.ne.s32.totalorder %s660_s1, %s463_s18  ;;  %p467_p1 = scmp.lt.u32.totalorder %s463_s18, %s660_s1 }
   0x7   :  { %p469_p2 = pnand %p467_p1, %p464_p0 }
   0x9   :  { %472 = shalt.err (!%p469_p2)
}
   0xa   :  { %s473_s23 = scalar_lea.vmem %s28_s13, 128  ;;  %p478_p4 = scmp.lt.s32.totalorder %s28_s13, %s28_s13 }
   0xb   :  { %p474_p3 = scmp.ne.s32.totalorder %s28_s13, %s473_s23  ;;  %p479_p5 = scmp.lt.s32.totalorder %s473_s23, %s473_s23 }
   0xd   :  { %p480_p6 = por %p479_p5, %p478_p4 }
   0xf   :  { %p481_p7 = pnand %p480_p6, %p474_p3 }
  0x11   :  { %484 = shalt.err (!%p481_p7)
}
  0x12   :  { %30 = dma.hbm_to_vmem [thread:$0]  %s660_s1, 128, %s28_s13, [#allocation6]  }
  0x13   :  { %s485_s28 = scalar_lea.hbm %s659_s0, 128 }
  0x14   :  { %p486_p8 = scmp.ne.s32.totalorder %s659_s0, %s485_s28  ;;  %p489_p9 = scmp.lt.u32.totalorder %s485_s28, %s659_s0 }
  0x16   :  { %p491_p10 = pnand %p489_p9, %p486_p8 }
  0x18   :  { %494 = shalt.err (!%p491_p10)
}
  0x19   :  { %s495_s6 = scalar_lea.vmem %s18_s15, 128  ;;  %p500_p12 = scmp.lt.s32.totalorder %s18_s15, %s18_s15 }
  0x1a   :  { %p496_p11 = scmp.ne.s32.totalorder %s18_s15, %s495_s6  ;;  %p501_p13 = scmp.lt.s32.totalorder %s495_s6, %s495_s6 }
  0x1c   :  { %p502_p0 = por %p501_p13, %p500_p12 }
  0x1e   :  { %p503_p1 = pnand %p502_p0, %p496_p11 }
  0x20   :  { %506 = shalt.err (!%p503_p1)
}
  0x21   :  { %20 = dma.hbm_to_vmem [thread:$0]  %s659_s0, 128, %s18_s15, [#allocation3]  }
  0x22   :  { %s559_s8 = smov [#allocation7]   ;;  %s507_s12 = scalar_lea.hbm %s661_s2, 512 }
  0x23   :  { %s36_s9 = sshll.u32 %s559_s8, 4  ;;  %p508_p2 = scmp.ne.s32.totalorder %s661_s2, %s507_s12  ;;  %s37_s9 = int_to_ptr.vmem [resolvable:$true] %s36_s9 }
  0x24   :  { %p511_p3 = scmp.lt.u32.totalorder %s507_s12, %s661_s2 }
  0x26   :  { %p513_p4 = pnand %p511_p3, %p508_p2 }
  0x28   :  { %516 = shalt.err (!%p513_p4)
}
  0x29   :  { %s517_s18 = scalar_lea.vmem %s37_s9, 512  ;;  %p522_p6 = scmp.lt.s32.totalorder %s37_s9, %s37_s9 }
  0x2a   :  { %p518_p5 = scmp.ne.s32.totalorder %s37_s9, %s517_s18  ;;  %p523_p7 = scmp.lt.s32.totalorder %s517_s18, %s517_s18 }
  0x2c   :  { %p524_p8 = por %p523_p7, %p522_p6 }
  0x2e   :  { %p525_p9 = pnand %p524_p8, %p518_p5 }
  0x30   :  { %528 = shalt.err (!%p525_p9)
}
  0x31   :  { %s560_s0 = smov 128   ;;  %s561_s15 = smov 8  }
  0x32   :  { %42 = dma.hbm_to_vmem [thread:$0]  %s661_s2, 512, %s37_s9, [#allocation6], %s560_s0, %s560_s0, %s561_s15  }
  0x33   :  { %551 = dma.done.wait [#allocation3], 128  }
  0x34   :  { %552 = vsyncadd [#allocation3], 4294967168 }
  0x35   :  { %553 = dma.done.wait [#allocation6], 640  }
  0x36   :  { %554 = vsyncadd [#allocation6], 4294966656  ;;  %v562_v0 = vmov 0.0|0.0   ;;  %vm563_vm0 = vmmov 0   ;;  %v564_v1 = vmov 0.0   ;;  %v54_v2 = vld [vmem:[#allocation7] sm:$0xff] }
  0x37   :  { %405 = vmatprep.subr.bf16.mxu0 %v562_v0  ;;  %391 = vmatprep.mubr.msk.f32.mxu0 %vm563_vm0, %v564_v1  ;;  %v55_v3 = vld [vmem:[#allocation7 + $0x8] sm:$0xff]  ;;  %v56_v4 = vld [vmem:[#allocation7 + $0x10] sm:$0xff]  ;;  %v57_v6 = vld [vmem:[#allocation7 + $0x18] sm:$0xff]  ;;  %vm58_vm1 = vcmask 261120   ;;  %vm306_vm2 = vcmask 261312   ;;  %vm236_vm3 = vcmask 130112  }
  0x38   :  { %411 = vmatprep.subr.bf16.mxu1 %v562_v0  ;;  %402 = vmatprep.mubr.msk.f32.mxu1 %vm563_vm0, %v564_v1  ;;  %v406_v5 = vpack.c.bf16 %v55_v3, %v54_v2  ;;  %v409_v7 = vpack.c.bf16 %v57_v6, %v56_v4  ;;  %v625_v8 = vld [vmem:[#allocation2] sm:$0xff]  ;;  %vm271_vm4 = vcmask 195712   ;;  %v53_v14 = vld [vmem:[#allocation5] sm:$0xff]  ;;  %s565_s2 = smov 120   ;;  %s566_s21 = smov 112   ;;  %vm209_vm5 = vcmask 64512  }
  0x39   :  { %s567_s22 = smov 104   ;;  %v205_v53 = vmul.f32 %v53_v14, %v625_v8  ;;  %s568_s23 = smov [#allocation8]   ;;  %vm353_vm6 = vcmask 57344  }
  0x3a   :  { %407 = vmatpush3.bf16.msra.mxu0 %v406_v5  ;;  %413 = vmatpush3.bf16.msra.mxu1 %v406_v5  ;;  %s361_s24 = sshll.u32 %s568_s23, 4  ;;  %s362_s24 = int_to_ptr.vmem [resolvable:$true] %s361_s24 }
  0x3b   :  { %408 = vmatprep.subr.bf16.mxu0 %v562_v0  ;;  %414 = vmatprep.subr.bf16.mxu1 %v562_v0  ;;  %v206_v54 = vsel %vm58_vm1, %v205_v53, 0.0  ;;  %s529_s25 = scalar_lea.vmem %s362_s24, 16  ;;  %s533_s26 = scalar_lea.vmem %s362_s24, 32 }
  0x3c   :  { %p530_p10 = scmp.ne.s32.totalorder %s362_s24, %s529_s25  ;;  %p534_p11 = scmp.lt.s32.totalorder %s362_s24, %s362_s24 }
  0x3d   :  { %p535_p12 = scmp.lt.s32.totalorder %s533_s26, %s529_s25 }
  0x3e   :  { %410 = vmatpush3.bf16.msra.mxu0 %v409_v7  ;;  %416 = vmatpush3.bf16.msra.mxu1 %v409_v7 }
  0x3f   :  { %p536_p13 = por %p535_p12, %p534_p11 }
  0x41   :  { %392 = vmatmul.mubr.msk.f32.vlgmr.msra.gmra.mrb[0].mxu0 %vm58_vm1, %v625_v8  ;;  %403 = vmatmul.mubr.msk.f32.vlgmr.msra.gmra.mrb[0].mxu1 %vm58_vm1, %v53_v14  ;;  %p537_p0 = pnand %p536_p13, %p530_p10 }
 0x114   :  { %v128_v9 = vpop.f32.mrb[0].mxu0  ;;  %v201_v34 = vpop.f32.mrb[0].mxu1 }
 0x115   :  { %v393_v10 = vpop.f32.mrb[1].mxu0  ;;  %v307_v11 = vsel %vm306_vm2, %v128_v9, -inf  ;;  %v237_v12 = vsel %vm236_vm3, %v128_v9, -inf  ;;  %v272_v13 = vsel %vm271_vm4, %v128_v9, -inf  ;;  %v210_v27 = vsel %vm209_vm5, %v128_v9, -inf  ;;  %v404_v35 = vpop.f32.mrb[1].mxu1 }
 0x116   :  { %308 = vmax.xlane.f32.xlu1 %v307_v11  ;;  %238 = vmax.xlane.f32.xlu0 %v237_v12 }
 0x11a   :  { %273 = vmax.xlane.f32.xlu0 %v272_v13 }
 0x1a3   :  { %v309_v15 = vpop.xlane.xlu1 %308  ;;  %v239_v16 = vpop.xlane.xlu0 %238 }
 0x1a4   :  { %v240_v17 = vsub.f32 %v128_v9, %v239_v16  ;;  %v310_v18 = vsub.f32 %v128_v9, %v309_v15 }
 0x1a6   :  { %v241_v19 = vmul.f32 1.442695, %v240_v17  ;;  %v311_v22 = vmul.f32 1.442695, %v310_v18 }
 0x1a7   :  { %v274_v20 = vpop.xlane.xlu0 %273 }
 0x1a8   :  { %v275_v21 = vsub.f32 %v128_v9, %v274_v20  ;;  %429 = vpow2.f32 %v241_v19 }
 0x1aa   :  { %v276_v23 = vmul.f32 1.442695, %v275_v21 }
 0x1ac   :  { %431 = vpow2.f32 %v276_v23 }
 0x1ad   :  { %433 = vpow2.f32 %v311_v22 }
 0x1b2   :  { %v430_v24 = vpop.eup %429 }
 0x1b3   :  { %244 = vrot.lane.b32.xlu1 %v430_v24, %s565_s2 }
 0x1b6   :  { %v432_v25 = vpop.eup %431 }
 0x1b7   :  { %v434_v26 = vpop.eup %433  ;;  %279 = vrot.lane.b32.xlu0 %v432_v25, %s566_s21 }
 0x1b8   :  { %314 = vrot.lane.b32.xlu1 %v434_v26, %s567_s22 }
 0x1dc   :  { %211 = vmax.xlane.f32.xlu1 %v210_v27 }
 0x225   :  { %v245_v28 = vpop.permute.xlu1 %244 }
 0x226   :  { %v247_v29 = vsel %vm209_vm5, %v245_v28, 0.0 }
 0x227   :  { %248 = vadd.xlane.f32.xlu0 %v247_v29 }
 0x229   :  { %v280_v30 = vpop.permute.xlu0 %279 }
 0x22a   :  { %v315_v31 = vpop.permute.xlu1 %314  ;;  %v282_v32 = vsel %vm209_vm5, %v280_v30, 0.0 }
 0x22b   :  { %v317_v33 = vsel %vm209_vm5, %v315_v31, 0.0  ;;  %283 = vadd.xlane.f32.xlu0 %v282_v32 }
 0x22c   :  { %318 = vadd.xlane.f32.xlu1 %v317_v33 }
 0x269   :  { %v212_v36 = vpop.xlane.xlu1 %211 }
 0x26a   :  { %v213_v37 = vsub.f32 %v128_v9, %v212_v36 }
 0x26c   :  { %v214_v38 = vmul.f32 1.442695, %v213_v37 }
 0x26e   :  { %435 = vpow2.f32 %v214_v38 }
 0x278   :  { %v436_v39 = vpop.eup %435 }
 0x279   :  { %v216_v40 = vsel %vm209_vm5, %v436_v39, 0.0 }
 0x27a   :  { %217 = vadd.xlane.f32.xlu0 %v216_v40 }
 0x2b4   :  { %v249_v41 = vpop.xlane.xlu0 %248 }
 0x2b5   :  { %437 = vrcp.f32 %v249_v41 }
 0x2b8   :  { %v284_v42 = vpop.xlane.xlu0 %283 }
 0x2b9   :  { %v319_v43 = vpop.xlane.xlu1 %318  ;;  %439 = vrcp.f32 %v284_v42 }
 0x2ba   :  { %441 = vrcp.f32 %v319_v43 }
 0x2bf   :  { %v438_v44 = vpop.eup %437 }
 0x2c0   :  { %v251_v45 = vmul.f32 %v438_v44, %v430_v24 }
 0x2c2   :  { %v252_v46 = vmul.f32 %v251_v45, %v201_v34 }
 0x2c3   :  { %v440_v47 = vpop.eup %439 }
 0x2c4   :  { %v442_v48 = vpop.eup %441  ;;  %254 = vrot.lane.b32.xlu1 %v252_v46, %s565_s2  ;;  %v286_v49 = vmul.f32 %v440_v47, %v432_v25 }
 0x2c5   :  { %v321_v50 = vmul.f32 %v442_v48, %v434_v26 }
 0x2c6   :  { %v287_v51 = vmul.f32 %v286_v49, %v201_v34 }
 0x2c7   :  { %v322_v52 = vmul.f32 %v321_v50, %v201_v34 }
 0x2c8   :  { %289 = vrot.lane.b32.xlu0 %v287_v51, %s566_s21 }
 0x2c9   :  { %324 = vrot.lane.b32.xlu1 %v322_v52, %s567_s22  ;;  %v346_v52 = vlaneseq }
 0x2cb   :  { %v347_v53 = vand.u32 127, %v346_v52 }
 0x2ed   :  { %207 = vadd.xlane.f32.xlu1 %v206_v54  ;;  %v349_v54 = vshrl.u32 %v346_v52, 7 }
 0x307   :  { %v218_v55 = vpop.xlane.xlu0 %217 }
 0x308   :  { %443 = vrcp.f32 %v218_v55 }
 0x312   :  { %v444_v56 = vpop.eup %443 }
 0x313   :  { %v220_v57 = vmul.f32 %v444_v56, %v436_v39 }
 0x315   :  { %v221_v58 = vmul.f32 %v220_v57, %v201_v34  ;;  %v350_v57 = vsub.s32 %v347_v53, %v349_v54 }
 0x317   :  { %v222_v59 = vsel %vm209_vm5, %v221_v58, 0.0 }
 0x318   :  { %223 = vadd.xlane.f32.xlu0 %v222_v59 }
 0x336   :  { %v255_v60 = vpop.permute.xlu1 %254 }
 0x337   :  { %v257_v61 = vsel %vm209_vm5, %v255_v60, 0.0 }
 0x338   :  { %258 = vadd.xlane.f32.xlu0 %v257_v61 }
 0x33a   :  { %v290_v62 = vpop.permute.xlu0 %289 }
 0x33b   :  { %v325_v63 = vpop.permute.xlu1 %324  ;;  %v292_v0 = vsel %vm209_vm5, %v290_v62, 0.0 }
 0x33c   :  { %293 = vadd.xlane.f32.xlu1 %v292_v0  ;;  %v327_v1 = vsel %vm209_vm5, %v325_v63, 0.0 }
 0x33d   :  { %328 = vadd.xlane.f32.xlu0 %v327_v1 }
 0x37a   :  { %v208_v3 = vpop.xlane.xlu1 %207 }
 0x3a5   :  { %v224_v2 = vpop.xlane.xlu0 %223 }
 0x3a6   :  { %v225_v4 = vadd.f32 %v224_v2, %v208_v3 }
 0x3a8   :  { %v227_v5 = vand.u32 2147483647, %v225_v4  ;;  %v226_v33 = vmax.f32 %v225_v4, 0.0 }
 0x3aa   :  { %v228_v6 = vsub.f32 0.0, %v227_v5 }
 0x3ac   :  { %v229_v7 = vmul.f32 1.442695, %v228_v6 }
 0x3ae   :  { %445 = vpow2.f32 %v229_v7 }
 0x3b8   :  { %v446_v19 = vpop.eup %445 }
 0x3b9   :  { %v231_v23 = vadd.f32 1.0, %v446_v19 }
 0x3c5   :  { %v259_v8 = vpop.xlane.xlu0 %258 }
 0x3c6   :  { %v260_v9 = vadd.f32 %v259_v8, %v208_v3 }
 0x3c8   :  { %v262_v10 = vand.u32 2147483647, %v260_v9  ;;  %v261_v36 = vmax.f32 %v260_v9, 0.0 }
 0x3c9   :  { %v294_v11 = vpop.xlane.xlu1 %293 }
 0x3ca   :  { %v263_v12 = vsub.f32 0.0, %v262_v10  ;;  %v329_v13 = vpop.xlane.xlu0 %328  ;;  %v295_v14 = vadd.f32 %v294_v11, %v208_v3 }
 0x3cb   :  { %v330_v15 = vadd.f32 %v329_v13, %v208_v3 }
 0x3cc   :  { %v264_v16 = vmul.f32 1.442695, %v263_v12  ;;  %v297_v17 = vand.u32 2147483647, %v295_v14  ;;  %v296_v42 = vmax.f32 %v295_v14, 0.0 }
 0x3cd   :  { %v332_v18 = vand.u32 2147483647, %v330_v15  ;;  %v331_v46 = vmax.f32 %v330_v15, 0.0 }
 0x3ce   :  { %447 = vpow2.f32 %v264_v16  ;;  %v298_v20 = vsub.f32 0.0, %v297_v17 }
 0x3cf   :  { %v333_v21 = vsub.f32 0.0, %v332_v18 }
 0x3d0   :  { %v299_v22 = vmul.f32 1.442695, %v298_v20 }
 0x3d1   :  { %v334_v24 = vmul.f32 1.442695, %v333_v21 }
 0x3d2   :  { %449 = vpow2.f32 %v299_v22 }
 0x3d3   :  { %451 = vpow2.f32 %v334_v24 }
 0x3d4   :  { %453 = vlog2.f32 %v231_v23 }
 0x3d8   :  { %v448_v25 = vpop.eup %447 }
 0x3d9   :  { %v266_v26 = vadd.f32 1.0, %v448_v25 }
 0x3db   :  { %455 = vlog2.f32 %v266_v26 }
 0x3dc   :  { %v450_v27 = vpop.eup %449 }
 0x3dd   :  { %v452_v28 = vpop.eup %451  ;;  %v301_v29 = vadd.f32 1.0, %v450_v27 }
 0x3de   :  { %v336_v30 = vadd.f32 1.0, %v452_v28  ;;  %v454_v31 = vpop.eup %453 }
 0x3df   :  { %457 = vlog2.f32 %v301_v29  ;;  %v233_v32 = vmul.f32 0.6931472, %v454_v31 }
 0x3e0   :  { %459 = vlog2.f32 %v336_v30 }
 0x3e1   :  { %v234_v35 = vadd.f32 %v233_v32, %v226_v33 }
 0x3e3   :  { %v235_v41 = vsub.f32 0.0, %v234_v35 }
 0x3e5   :  { %v456_v34 = vpop.eup %455 }
 0x3e6   :  { %v268_v37 = vmul.f32 0.6931472, %v456_v34 }
 0x3e8   :  { %v269_v38 = vadd.f32 %v268_v37, %v261_v36 }
 0x3e9   :  { %v458_v39 = vpop.eup %457 }
 0x3ea   :  { %v460_v40 = vpop.eup %459  ;;  %v303_v43 = vmul.f32 0.6931472, %v458_v39  ;;  %v270_v45 = vsub.f32 %v235_v41, %v269_v38 }
 0x3eb   :  { %v338_v44 = vmul.f32 0.6931472, %v460_v40 }
 0x3ec   :  { %v304_v47 = vadd.f32 %v303_v43, %v296_v42 }
 0x3ed   :  { %v339_v48 = vadd.f32 %v338_v44, %v331_v46 }
 0x3ee   :  { %v305_v49 = vsub.f32 %v270_v45, %v304_v47 }
 0x3f0   :  { %v340_v50 = vsub.f32 %v305_v49, %v339_v48 }
 0x3f2   :  { %v341_v51 = vadd.f32 -1.0, %v340_v50 }
 0x3f4   :  { %461 = vrcp.f32 %v341_v51 }
 0x3fe   :  { %v462_v55 = vpop.eup %461 }
 0x3ff   :  { %v343_v56 = vmul.f32 -1.0, %v462_v55 }
 0x401   :  { %v344_v58 = vsub.f32 1.0, %v343_v56 }
 0x403   :  { %v351_v59 = vrot.slane %v344_v58, %v350_v57 }
 0x405   :  { %354 = vst.msk [vmem:[#allocation8] sm:$0x1] %vm353_vm6, %v351_v59 }
 0x406   :  { %540 = shalt.err (!%p537_p0)
}
 0x407   :  { %s541_s29 = scalar_lea.hbm %s662_s3, 16 }
 0x408   :  { %p542_p1 = scmp.ne.s32.totalorder %s662_s3, %s541_s29  ;;  %p545_p2 = scmp.lt.u32.totalorder %s541_s29, %s662_s3 }
 0x40a   :  { %p547_p3 = pnand %p545_p2, %p542_p1 }
 0x40c   :  { %550 = shalt.err (!%p547_p3)
}
 0x40d   :  { %364 = dma.vmem_to_hbm [thread:$0]  %s362_s24, 16, %s662_s3, [#allocation4]  }
 0x40e   :  { %555 = dma.done.wait [#allocation4], 16  }
 0x40f   :  { %556 = vsyncadd [#allocation4], 4294967280 }
 0x410   :  { %368 = vsyncpa [#allocation3], 1 }
 0x411   :  { %369 = vsyncpa [#allocation6], 1 }
 0x412   :  { %370 = vsyncpa [#allocation4], 1 }

</bundles_post_ra>
